<compile_context>
chip_gen: v5e
topology: v5e:2x2
jax: 0.10.0
libtpu: 0.0.40
codegen_flags: <defaults>
</compile_context>

<pallas_src>
import functools

import jax
import jax.numpy as jnp
from jax.experimental import pallas as pl
from jax.experimental.pallas import tpu as pltpu


def _round_up(n, m):
    return ((n + m - 1) // m) * m


def _vmem_limit_bytes():
    """Generation-aware VMEM budget: ~85% of physical, leaving headroom for
    compiler scratch / pipeline buffers (v5e/v6e ~109 MiB, v7x ~54 MiB)."""
    try:
        cap = getattr(pltpu.get_tpu_info(), "vmem_capacity_bytes", None)
        if cap:
            return int(cap * 0.85)
    except Exception:
        pass
    return 48 * 1024 * 1024  # conservative fallback that also fits v7x (64 MiB)


def _fused_mlp_kernel(*refs, num_layers, hidden_relu, output_relu):
    """Fused MLP: refs = (x, w0, b0, w1, b1, ..., w{L-1}, b{L-1}, out).

    Activations stay in vregs/VMEM across layers.  Matmul operands are cast to
    the (bf16) weight dtype right before each dot; accumulation and the
    bias+ReLU epilogue are f32 (cheap on all generations, incl. v5e's VPU).
    """
    x_ref = refs[0]
    o_ref = refs[-1]

    h = x_ref[...]  # (TM, Din_p) f32
    for i in range(num_layers):
        w_ref = refs[1 + 2 * i]
        b_ref = refs[2 + 2 * i]
        h = jnp.dot(
            h.astype(w_ref.dtype), w_ref[...], preferred_element_type=jnp.float32
        )
        h = h + b_ref[...]  # (1, Dout_p) f32 broadcasts over batch rows
        is_last = i == num_layers - 1
        if (hidden_relu and not is_last) or (output_relu and is_last):
            h = jnp.maximum(h, 0.0)
    o_ref[...] = h.astype(o_ref.dtype)


def prepare_mlp_params(params, weight_dtype=jnp.bfloat16):
    """Pad weights/biases to lane-aligned (multiple-of-128) feature dims and
    cast weights to `weight_dtype` ONCE (outside the per-call path).

    Zero padding is exact: padded weight rows/cols and bias lanes are zero, so
    padded lanes carry zeros through every layer.
    """
    dims = [params[0][0].shape[0]] + [w.shape[1] for w, _ in params]
    dims_p = [_round_up(max(d, 128), 128) for d in dims]
    padded = []
    for i, (w, b) in enumerate(params):
        w_p = jnp.pad(
            w, ((0, dims_p[i] - w.shape[0]), (0, dims_p[i + 1] - w.shape[1]))
        ).astype(weight_dtype)
        b_p = jnp.pad(b, ((0, 0), (0, dims_p[i + 1] - b.shape[1]))).astype(jnp.float32)
        padded += [w_p, b_p]
    return tuple(padded), tuple(dims), tuple(dims_p)


def mlp_forward(x, prepared, act="relu", output_act=None):
    """Fused Pallas MLP forward.

    x: (B, Din) f32; prepared: output of prepare_mlp_params.
    Batch is padded to a multiple of 8 (and tiled at up to 256 rows); feature
    dims are already lane-padded.  The result is sliced back to (B, out_dim).
    """
    if act not in ("relu", None) or output_act not in ("relu", None):
        # TODO(synk): add other fused activations (gelu/tanh via EUP) here.
        raise NotImplementedError("only 'relu' / identity activations are fused")

    padded_params, dims, dims_p = prepared
    num_layers = len(dims) - 1
    Din, out_dim = dims[0], dims[-1]
    Din_p, Dout_p = dims_p[0], dims_p[-1]

    B = x.shape[0]
    Bp = _round_up(max(B, 8), 8)
    TM = min(Bp, 256)          # 256-row tiles amortize MXU fill on v6e/v7x
    Bp = _round_up(Bp, TM)
    num_m = Bp // TM

    x_p = jnp.pad(x, ((0, Bp - B), (0, Din_p - Din)))

    # x / out stream over the batch grid axis; weights & biases use constant
    # index maps so they are DMA'd once and stay resident across grid steps.
    in_specs = [pl.BlockSpec((TM, Din_p), lambda i: (i, 0))]
    for li in range(num_layers):
        in_specs.append(pl.BlockSpec((dims_p[li], dims_p[li + 1]), lambda i: (0, 0)))
        in_specs.append(pl.BlockSpec((1, dims_p[li + 1]), lambda i: (0, 0)))
    out_spec = pl.BlockSpec((TM, Dout_p), lambda i: (i, 0))

    flops = sum(2 * Bp * dims_p[i] * dims_p[i + 1] for i in range(num_layers))
    bytes_accessed = (
        x_p.size * x_p.dtype.itemsize
        + sum(p.size * p.dtype.itemsize for p in padded_params)
        + Bp * Dout_p * x.dtype.itemsize
    )

    # TODO(synk): for layers whose padded bf16 weight exceeds the VMEM budget,
    # stream K/N chunks inside the kernel via pltpu.emit_pipeline with an f32
    # accumulator (memory_space=pl.ANY weight spec) instead of one resident
    # block; and bump x/out specs to pipeline_mode=pl.Buffered(3) if a profile
    # shows exposed DMA for large-batch / small-hidden configs.
    out_p = pl.pallas_call(
        functools.partial(
            _fused_mlp_kernel,
            num_layers=num_layers,
            hidden_relu=(act == "relu"),
            output_relu=(output_act == "relu"),
        ),
        grid=(num_m,),
        out_shape=jax.ShapeDtypeStruct((Bp, Dout_p), x.dtype),
        in_specs=in_specs,
        out_specs=out_spec,
        cost_estimate=pl.CostEstimate(
            flops=flops, transcendentals=0, bytes_accessed=bytes_accessed
        ),
        compiler_params=pltpu.CompilerParams(
            dimension_semantics=("parallel",),
            vmem_limit_bytes=_vmem_limit_bytes(),
        ),
    )(x_p, *padded_params)

    return out_p[:B, :out_dim]


def init_mlp_params(key, input_dim, output_dim, hidden_dims):
    """Deterministic synthetic parameters matching nn.Linear shapes.

    PyTorch stores weight as (out, in); we store the transposed (in, out)
    layout so the kernel computes x @ W directly (same math as x @ weight.T).
    """
    dims = [input_dim] + list(hidden_dims) + [output_dim]
    params = []
    for i in range(len(dims) - 1):
        key, wk = jax.random.split(key)
        fan_in = dims[i]
        w = jax.random.normal(wk, (dims[i], dims[i + 1]), jnp.float32)
        w = w * (1.0 / jnp.sqrt(jnp.float32(fan_in)))
        b = jnp.zeros((1, dims[i + 1]), jnp.float32)
        params.append((w, b))
    return params


def mlp_reference(x, params, act="relu", output_act=None):
    out = x
    for w, b in params[:-1]:
        out = out @ w + b
        if act == "relu":
            out = jnp.maximum(out, 0.0)
    w, b = params[-1]
    out = out @ w + b
    if output_act == "relu":
        out = jnp.maximum(out, 0.0)
    return out


if __name__ == "__main__":
    key = jax.random.PRNGKey(0)
    key, xk = jax.random.split(key)

    batch = 8
    input_dim = 32
    hidden_dims = [64, 48]
    output_dim = 16

    x = jax.random.normal(xk, (batch, input_dim), jnp.float32)
    params = init_mlp_params(key, input_dim, output_dim, hidden_dims)
    ref = mlp_reference(x, params, act="relu", output_act=None)

    # Main (performance) config: bf16 MXU operands, f32 accumulation/epilogue.
    prepared_bf16 = prepare_mlp_params(params, weight_dtype=jnp.bfloat16)
    out = mlp_forward(x, prepared_bf16, act="relu", output_act=None)
    out = jax.block_until_ready(out)
    assert out.shape == (batch, output_dim)
    assert jnp.allclose(out, ref, atol=3e-2, rtol=3e-2), float(
        jnp.max(jnp.abs(out - ref))
    )

    # Tight numerical check with f32 weights (same kernel path, full precision).
    prepared_f32 = prepare_mlp_params(params, weight_dtype=jnp.float32)
    out_f32 = mlp_forward(x, prepared_f32, act="relu", output_act=None)
    out_f32 = jax.block_until_ready(out_f32)
    assert jnp.allclose(out_f32, ref, atol=1e-4, rtol=1e-4), float(
        jnp.max(jnp.abs(out_f32 - ref))
    )

    print("KERNEL_OK")
</pallas_src>

<mosaic_0001>
module attributes {stable_mosaic.version = 11 : i64} {
  func.func @_fused_mlp_kernel(%arg0: i32, %arg1: memref<8x128xf32, #tpu.memory_space<vmem>>, %arg2: memref<128x128xbf16, #tpu.memory_space<vmem>>, %arg3: memref<1x128xf32, #tpu.memory_space<vmem>>, %arg4: memref<128x128xbf16, #tpu.memory_space<vmem>>, %arg5: memref<1x128xf32, #tpu.memory_space<vmem>>, %arg6: memref<128x128xbf16, #tpu.memory_space<vmem>>, %arg7: memref<1x128xf32, #tpu.memory_space<vmem>>, %arg8: memref<8x128xf32, #tpu.memory_space<vmem>>) attributes {dimension_semantics = [#tpu.dimension_semantics<parallel>], iteration_bounds = array<i64: 1>, scalar_prefetch = 0 : i64, scratch_operands = 0 : i64, tpu.core_type = #tpu.core_type<tc>, window_params = [{transform_indices = @transform_0, window_bounds = array<i64: 8, 128>}, {pipeline_mode = #tpu.pipeline_mode<synchronous>, transform_indices = @transform_1, window_bounds = array<i64: 128, 128>}, {pipeline_mode = #tpu.pipeline_mode<synchronous>, transform_indices = @transform_2, window_bounds = array<i64: 1, 128>}, {pipeline_mode = #tpu.pipeline_mode<synchronous>, transform_indices = @transform_3, window_bounds = array<i64: 128, 128>}, {pipeline_mode = #tpu.pipeline_mode<synchronous>, transform_indices = @transform_4, window_bounds = array<i64: 1, 128>}, {pipeline_mode = #tpu.pipeline_mode<synchronous>, transform_indices = @transform_5, window_bounds = array<i64: 128, 128>}, {pipeline_mode = #tpu.pipeline_mode<synchronous>, transform_indices = @transform_6, window_bounds = array<i64: 1, 128>}, {transform_indices = @transform_7, window_bounds = array<i64: 8, 128>}]} {
    %c0 = arith.constant 0 : index
    %c0_0 = arith.constant 0 : index
    %0 = vector.load %arg1[%c0, %c0_0] : memref<8x128xf32, #tpu.memory_space<vmem>>, vector<8x128xf32>
    %1 = arith.truncf %0 : vector<8x128xf32> to vector<8x128xbf16>
    %c0_1 = arith.constant 0 : index
    %c0_2 = arith.constant 0 : index
    %2 = vector.load %arg2[%c0_1, %c0_2] : memref<128x128xbf16, #tpu.memory_space<vmem>>, vector<128x128xbf16>
    %cst = arith.constant dense<0.000000e+00> : vector<8x128xf32>
    %3 = tpu.matmul %1, %2, %cst {dimension_numbers = #tpu.dot_dimension_numbers<[1], [0], [0], [1], [0, 0, 1, 1], [], []>} : vector<8x128xbf16>, vector<128x128xbf16>, vector<8x128xf32> -> vector<8x128xf32>
    %c0_3 = arith.constant 0 : index
    %c0_4 = arith.constant 0 : index
    %4 = vector.load %arg3[%c0_3, %c0_4] : memref<1x128xf32, #tpu.memory_space<vmem>>, vector<1x128xf32>
    %5 = vector.broadcast %4 : vector<1x128xf32> to vector<8x128xf32>
    %6 = arith.addf %3, %5 : vector<8x128xf32>
    %cst_5 = arith.constant 0.000000e+00 : f32
    %7 = vector.broadcast %cst_5 : f32 to vector<8x128xf32>
    %8 = arith.maximumf %6, %7 : vector<8x128xf32>
    %9 = arith.truncf %8 : vector<8x128xf32> to vector<8x128xbf16>
    %c0_6 = arith.constant 0 : index
    %c0_7 = arith.constant 0 : index
    %10 = vector.load %arg4[%c0_6, %c0_7] : memref<128x128xbf16, #tpu.memory_space<vmem>>, vector<128x128xbf16>
    %cst_8 = arith.constant dense<0.000000e+00> : vector<8x128xf32>
    %11 = tpu.matmul %9, %10, %cst_8 {dimension_numbers = #tpu.dot_dimension_numbers<[1], [0], [0], [1], [0, 0, 1, 1], [], []>} : vector<8x128xbf16>, vector<128x128xbf16>, vector<8x128xf32> -> vector<8x128xf32>
    %c0_9 = arith.constant 0 : index
    %c0_10 = arith.constant 0 : index
    %12 = vector.load %arg5[%c0_9, %c0_10] : memref<1x128xf32, #tpu.memory_space<vmem>>, vector<1x128xf32>
    %13 = vector.broadcast %12 : vector<1x128xf32> to vector<8x128xf32>
    %14 = arith.addf %11, %13 : vector<8x128xf32>
    %cst_11 = arith.constant 0.000000e+00 : f32
    %15 = vector.broadcast %cst_11 : f32 to vector<8x128xf32>
    %16 = arith.maximumf %14, %15 : vector<8x128xf32>
    %17 = arith.truncf %16 : vector<8x128xf32> to vector<8x128xbf16>
    %c0_12 = arith.constant 0 : index
    %c0_13 = arith.constant 0 : index
    %18 = vector.load %arg6[%c0_12, %c0_13] : memref<128x128xbf16, #tpu.memory_space<vmem>>, vector<128x128xbf16>
    %cst_14 = arith.constant dense<0.000000e+00> : vector<8x128xf32>
    %19 = tpu.matmul %17, %18, %cst_14 {dimension_numbers = #tpu.dot_dimension_numbers<[1], [0], [0], [1], [0, 0, 1, 1], [], []>} : vector<8x128xbf16>, vector<128x128xbf16>, vector<8x128xf32> -> vector<8x128xf32>
    %c0_15 = arith.constant 0 : index
    %c0_16 = arith.constant 0 : index
    %20 = vector.load %arg7[%c0_15, %c0_16] : memref<1x128xf32, #tpu.memory_space<vmem>>, vector<1x128xf32>
    %21 = vector.broadcast %20 : vector<1x128xf32> to vector<8x128xf32>
    %22 = arith.addf %19, %21 : vector<8x128xf32>
    %c0_17 = arith.constant 0 : index
    %c0_18 = arith.constant 0 : index
    %23 = vector.load %arg8[%c0_17, %c0_18] : memref<8x128xf32, #tpu.memory_space<vmem>>, vector<8x128xf32>
    tpu.vector_store %arg8[%c0_17, %c0_18], %22 {strides = array<i32>} : memref<8x128xf32, #tpu.memory_space<vmem>>, vector<8x128xf32>,
    return
  }
  func.func @transform_0(%arg0: i32) -> (i32, i32) {
    %c0_i32 = arith.constant 0 : i32
    %c0_i32_0 = arith.constant 0 : i32
    return %arg0, %c0_i32 : i32, i32
  }
  func.func @transform_1(%arg0: i32) -> (i32, i32) {
    %c0_i32 = arith.constant 0 : i32
    %c0_i32_0 = arith.constant 0 : i32
    %c0_i32_1 = arith.constant 0 : i32
    return %c0_i32, %c0_i32_0 : i32, i32
  }
  func.func @transform_2(%arg0: i32) -> (i32, i32) {
    %c0_i32 = arith.constant 0 : i32
    %c0_i32_0 = arith.constant 0 : i32
    %c0_i32_1 = arith.constant 0 : i32
    return %c0_i32, %c0_i32_0 : i32, i32
  }
  func.func @transform_3(%arg0: i32) -> (i32, i32) {
    %c0_i32 = arith.constant 0 : i32
    %c0_i32_0 = arith.constant 0 : i32
    %c0_i32_1 = arith.constant 0 : i32
    return %c0_i32, %c0_i32_0 : i32, i32
  }
  func.func @transform_4(%arg0: i32) -> (i32, i32) {
    %c0_i32 = arith.constant 0 : i32
    %c0_i32_0 = arith.constant 0 : i32
    %c0_i32_1 = arith.constant 0 : i32
    return %c0_i32, %c0_i32_0 : i32, i32
  }
  func.func @transform_5(%arg0: i32) -> (i32, i32) {
    %c0_i32 = arith.constant 0 : i32
    %c0_i32_0 = arith.constant 0 : i32
    %c0_i32_1 = arith.constant 0 : i32
    return %c0_i32, %c0_i32_0 : i32, i32
  }
  func.func @transform_6(%arg0: i32) -> (i32, i32) {
    %c0_i32 = arith.constant 0 : i32
    %c0_i32_0 = arith.constant 0 : i32
    %c0_i32_1 = arith.constant 0 : i32
    return %c0_i32, %c0_i32_0 : i32, i32
  }
  func.func @transform_7(%arg0: i32) -> (i32, i32) {
    %c0_i32 = arith.constant 0 : i32
    %c0_i32_0 = arith.constant 0 : i32
    return %arg0, %c0_i32 : i32, i32
  }
}

</mosaic_0001>

<bundles_post_ra>
// kernel: tpu_custom_call.1
= control target key start
LH: loop header
LB: loop body
LE: loop exit
PB: predicated region body
PF: predicated region fallthrough
CT: control target
= control target key end

     0   :  { %12 = vsyncpa [#allocation3], 0  ;;  %s686_s0 = inlined_call_operand.hbm [shape: f32[8,128], index: 0, kind: input, shape index: {}]   ;;  %s687_s1 = inlined_call_operand.hbm [shape: bf16[128,128], index: 1, kind: input, shape index: {}]   ;;  %s688_s2 = inlined_call_operand.vmem [shape: f32[1,128], index: 2, kind: input, shape index: {}]   ;;  %s689_s3 = inlined_call_operand.hbm [shape: bf16[128,128], index: 3, kind: input, shape index: {}]   ;;  %s690_s4 = inlined_call_operand.vmem [shape: f32[1,128], index: 4, kind: input, shape index: {}]   ;;  %s691_s5 = inlined_call_operand.hbm [shape: bf16[128,128], index: 5, kind: input, shape index: {}]   ;;  %s692_s6 = inlined_call_operand.vmem [shape: f32[1,128], index: 6, kind: input, shape index: {}]   ;;  %s693_s7 = inlined_call_operand.hbm [shape: f32[8,128], index: 7, kind: output, shape index: {}]  }
   0x1   :  { %13 = vsyncpa [#allocation6], 0 }
   0x2   :  { %14 = vsyncpa [#allocation9], 0  ;;  %s31_s26 = sshll.u32 %s687_s1, 4  ;;  %s32_s26 = int_to_ptr.hbm [resolvable:$true] %s31_s26 }
   0x3   :  { %15 = vsyncpa [#allocation4], 0  ;;  %s615_s27 = smov [#allocation5]   ;;  %s21_s8 = sshll.u32 %s686_s0, 4  ;;  %s22_s8 = int_to_ptr.hbm [resolvable:$true] %s21_s8 }
   0x4   :  { %s33_s28 = sshll.u32 %s615_s27, 4  ;;  %s616_s9 = smov 64   ;;  %s34_s28 = int_to_ptr.vmem [resolvable:$true] %s33_s28 }
   0x5   :  { %s617_s10 = smov 4   ;;  %s618_s11 = smov [#allocation2]  }
   0x6   :  { %39 = dma.hbm_to_vmem [thread:$0]  %s32_s26, 1024, %s34_s28, [#allocation6], %s616_s9, %s616_s9, %s617_s10  }
   0x7   :  { %s23_s12 = sshll.u32 %s618_s11, 4  ;;  %s46_s15 = sshll.u32 %s689_s3, 4  ;;  %s24_s12 = int_to_ptr.vmem [resolvable:$true] %s23_s12  ;;  %s47_s15 = int_to_ptr.hbm [resolvable:$true] %s46_s15 }
   0x8   :  { %26 = dma.hbm_to_vmem [thread:$0]  %s22_s8, 128, %s24_s12, [#allocation3]  }
   0x9   :  { %s61_s17 = sshll.u32 %s691_s5, 4  ;;  %s619_s18 = smov [#allocation7]   ;;  %s62_s17 = int_to_ptr.hbm [resolvable:$true] %s61_s17 }
   0xa   :  { %s48_s19 = sshll.u32 %s619_s18, 4  ;;  %s620_s0 = smov [#allocation8]   ;;  %s49_s19 = int_to_ptr.vmem [resolvable:$true] %s48_s19 }
   0xb   :  { %54 = dma.hbm_to_vmem [thread:$0]  %s47_s15, 1024, %s49_s19, [#allocation6], %s616_s9, %s616_s9, %s617_s10  }
   0xc   :  { %s63_s20 = sshll.u32 %s620_s0, 4  ;;  %s64_s20 = int_to_ptr.vmem [resolvable:$true] %s63_s20 }
   0xd   :  { %69 = dma.hbm_to_vmem [thread:$0]  %s62_s17, 1024, %s64_s20, [#allocation9], %s616_s9, %s616_s9, %s617_s10  }
   0xe   :  { %607 = dma.done.wait [#allocation3], 128  }
   0xf   :  { %608 = vsyncadd [#allocation3], 4294967168 }
  0x10   :  { %609 = dma.done.wait [#allocation6], 2048  }
  0x11   :  { %610 = vsyncadd [#allocation6], 4294965248 }
  0x12   :  { %611 = dma.done.wait [#allocation9], 1024  }
  0x13   :  { %612 = vsyncadd [#allocation9], 4294966272  ;;  %v460_v0 = vld [vmem:[#allocation5 + $0x38] sm:$0xff]  ;;  %v459_v1 = vld [vmem:[#allocation5 + $0x30] sm:$0xff]  ;;  %s621_s24 = smov [#allocation10]   ;;  %s345_s28 = sshll.u32 %s693_s7, 4  ;;  %s346_s28 = int_to_ptr.hbm [resolvable:$true] %s345_s28 }
  0x14   :  { %158 = vmatpush.bf16.msra.mxu0 %v460_v0  ;;  %v468_v2 = vld [vmem:[#allocation7 + $0x38] sm:$0xff]  ;;  %v467_v3 = vld [vmem:[#allocation7 + $0x30] sm:$0xff]  ;;  %v458_v4 = vld [vmem:[#allocation5 + $0x28] sm:$0xff]  ;;  %s343_s25 = sshll.u32 %s621_s24, 4  ;;  %s344_s25 = int_to_ptr.vmem [resolvable:$true] %s343_s25 }
  0x15   :  { %241 = vmatpush.bf16.msra.mxu1 %v468_v2  ;;  %v466_v5 = vld [vmem:[#allocation7 + $0x28] sm:$0xff]  ;;  %v457_v6 = vld [vmem:[#allocation5 + $0x20] sm:$0xff]  ;;  %v456_v8 = vld [vmem:[#allocation5 + $0x18] sm:$0xff] }
  0x16   :  { %v465_v7 = vld [vmem:[#allocation7 + $0x20] sm:$0xff]  ;;  %v464_v9 = vld [vmem:[#allocation7 + $0x18] sm:$0xff]  ;;  %v455_v10 = vld [vmem:[#allocation5 + $0x10] sm:$0xff] }
  0x17   :  { %v463_v11 = vld [vmem:[#allocation7 + $0x10] sm:$0xff]  ;;  %v454_v12 = vld [vmem:[#allocation5 + $0x8] sm:$0xff]  ;;  %v453_v13 = vld [vmem:[#allocation5] sm:$0xff] }
  0x18   :  { %159 = vmatpush.bf16.msra.mxu0 %v459_v1  ;;  %v88_v14 = vld [vmem:[#allocation2] sm:$0xff]  ;;  %v462_v16 = vld [vmem:[#allocation7 + $0x8] sm:$0xff]  ;;  %v461_v17 = vld [vmem:[#allocation7] sm:$0xff] }
  0x19   :  { %242 = vmatpush.bf16.msra.mxu1 %v467_v3  ;;  %v89_v15 = vpack.c.bf16 %v88_v14, %v88_v14  ;;  %v476_v18 = vld [vmem:[#allocation8 + $0x38] sm:$0xff]  ;;  %v475_v19 = vld [vmem:[#allocation8 + $0x30] sm:$0xff]  ;;  %v474_v20 = vld [vmem:[#allocation8 + $0x28] sm:$0xff] }
  0x1a   :  { %324 = vmatpush.bf16.msra.mxu2 %v476_v18  ;;  %v473_v21 = vld [vmem:[#allocation8 + $0x20] sm:$0xff]  ;;  %v472_v22 = vld [vmem:[#allocation8 + $0x18] sm:$0xff]  ;;  %v471_v23 = vld [vmem:[#allocation8 + $0x10] sm:$0xff] }
  0x1b   :  { %v484_v24 = vld [vmem:[%s688_s2] ss:$0 sm:$0xff]  ;;  %v470_v30 = vld [vmem:[#allocation8 + $0x8] sm:$0xff]  ;;  %v469_v31 = vld [vmem:[#allocation8] sm:$0xff] }
  0x1c   :  { %160 = vmatpush.bf16.msra.mxu0 %v458_v4  ;;  %v485_v32 = vld [vmem:[%s690_s4] ss:$0 sm:$0xff] }
  0x1d   :  { %243 = vmatpush.bf16.msra.mxu1 %v466_v5  ;;  %v486_v38 = vld [vmem:[%s692_s6] ss:$0 sm:$0xff] }
  0x1e   :  { %325 = vmatpush.bf16.msra.mxu2 %v475_v19 }
  0x20   :  { %161 = vmatpush.bf16.msra.mxu0 %v457_v6 }
  0x21   :  { %244 = vmatpush.bf16.msra.mxu1 %v465_v7 }
  0x22   :  { %326 = vmatpush.bf16.msra.mxu2 %v474_v20 }
  0x24   :  { %162 = vmatpush.bf16.msra.mxu0 %v456_v8 }
  0x25   :  { %245 = vmatpush.bf16.msra.mxu1 %v464_v9 }
  0x26   :  { %327 = vmatpush.bf16.msra.mxu2 %v473_v21 }
  0x28   :  { %163 = vmatpush.bf16.msra.mxu0 %v455_v10 }
  0x29   :  { %246 = vmatpush.bf16.msra.mxu1 %v463_v11 }
  0x2a   :  { %328 = vmatpush.bf16.msra.mxu2 %v472_v22 }
  0x2c   :  { %164 = vmatpush.bf16.msra.mxu0 %v454_v12 }
  0x2d   :  { %247 = vmatpush.bf16.msra.mxu1 %v462_v16 }
  0x2e   :  { %329 = vmatpush.bf16.msra.mxu2 %v471_v23 }
  0x30   :  { %165 = vmatpush.bf16.msra.mxu0 %v453_v13 }
  0x31   :  { %248 = vmatpush.bf16.msra.mxu1 %v461_v17 }
  0x32   :  { %330 = vmatpush.bf16.msra.mxu2 %v470_v30 }
  0x33   :  { %166 = vmatmul.bf16.vlgmr.msra.gmra.mxu0 %v89_v15 }
  0x36   :  { %331 = vmatpush.bf16.msra.mxu2 %v469_v31 }
  0xb0   :  { %v167_v25 = vpop.f32.mrf.mxu0 }
  0xb1   :  { %v168_v26 = vadd.f32 %v484_v24, %v167_v25 }
  0xb3   :  { %v171_v27 = vmax.f32 %v168_v26, 0.0 }
  0xb5   :  { %v172_v28 = vpack.c.bf16 %v171_v27, %v171_v27 }
  0xb7   :  { %249 = vmatmul.bf16.vlgmr.msra.gmra.mxu1 %v172_v28 }
  0xb8   :  { %v169_v29 = vpop.f32.mrf.mxu0 }
 0x134   :  { %v250_v33 = vpop.f32.mrf.mxu1 }
 0x135   :  { %v251_v34 = vadd.f32 %v485_v32, %v250_v33 }
 0x137   :  { %v254_v35 = vmax.f32 %v251_v34, 0.0 }
 0x139   :  { %v255_v36 = vpack.c.bf16 %v254_v35, %v254_v35 }
 0x13b   :  { %332 = vmatmul.bf16.vlgmr.msra.gmra.mxu2 %v255_v36 }
 0x13c   :  { %v252_v37 = vpop.f32.mrf.mxu1 }
 0x1be   :  { %v333_v39 = vpop.f32.mrf.mxu2 }
 0x1bf   :  { %v334_v40 = vadd.f32 %v486_v38, %v333_v39 }
 0x1c1   :  { %337 = vst [vmem:[#allocation10] sm:$0xff] %v334_v40 }
 0x1c2   :  { %348 = dma.vmem_to_hbm [thread:$0]  %s344_s25, 128, %s346_s28, [#allocation4]  }
 0x1c6   :  { %v335_v41 = vpop.f32.mrf.mxu2 }
 0x1c7   :  { %613 = dma.done.wait [#allocation4], 128  }
 0x1c8   :  { %614 = vsyncadd [#allocation4], 4294967168 }
 0x1c9   :  { %353 = vsyncpa [#allocation3], 1 }
 0x1ca   :  { %354 = vsyncpa [#allocation6], 1 }
 0x1cb   :  { %355 = vsyncpa [#allocation9], 1 }
 0x1cc   :  { %356 = vsyncpa [#allocation4], 1 }

</bundles_post_ra>
